<compile_context>
chip_gen: v5e
topology: v5e:2x2
jax: 0.10.0
libtpu: 0.0.40
codegen_flags: <defaults>
</compile_context>

<pallas_src>
import jax
import jax.numpy as jnp
from jax import lax
from jax.experimental import pallas as pl
from jax.experimental.pallas import tpu as pltpu

_LANE = 128


def _vmem_config():
    """(physical VMEM bytes, budget for our explicitly managed buffers)."""
    cap = 64 * 1024 * 1024                      # conservative fallback (v7x per-TC)
    try:
        info = pltpu.get_tpu_info()
        cap = int(getattr(info, "vmem_capacity_bytes", cap) or cap)
    except Exception:
        pass
    # ~45 MiB on v7x (64 MiB physical), ~90-100 MiB on v5e/v6e (128 MiB physical).
    budget = max(16 << 20, min(int(cap * 0.70), 100 << 20))
    return cap, budget


def _select_tiles(B, C, HW, dtype_bytes, vmem_budget, b_tile, hw_tile):
    """Budget-driven batch / spatial tile selection (no padding of HW)."""
    hw_aligned = pl.cdiv(HW, _LANE) * _LANE
    hw_cap = min(2048, hw_aligned)              # review: raise cap to 1024-2048 lanes

    def need_bytes(bt, hwt):
        return (2 * bt * C * hwt * dtype_bytes  # double-buffered x tile
                + bt * C * _LANE * 4            # per-lane f32 accumulator scratch
                + 4 * C + 8 * bt + (64 << 10))  # weight / output / misc slack

    if b_tile is None:
        # The output block is (b_tile, 1): its sublane dim must be a multiple of 8
        # or equal the full batch dim.  Among legal divisors of B prefer:
        #   (a) >= 2 grid steps on the "parallel" axis (v7x has 2 TensorCores),
        #   (b) >= ~1 MiB moved per grid step when C is small,
        #   (c) fitting the VMEM budget with hw_tile >= 512.
        cands = [d for d in range(8, B + 1, 8) if B % d == 0]
        if not cands:
            b_tile = B
        else:
            par = [d for d in cands if d <= B // 2] or cands
            want = max(8, -(-(1 << 20) // max(1, C * hw_cap * dtype_bytes)))
            fit = [d for d in par
                   if d <= want and need_bytes(d, min(512, hw_cap)) <= vmem_budget]
            b_tile = max(fit) if fit else min(par)
    if B % b_tile:
        b_tile = B
    n_b = B // b_tile

    if hw_tile is None:
        hw_tile = hw_cap
        while hw_tile > _LANE and need_bytes(b_tile, hw_tile) > vmem_budget:
            hw_tile -= _LANE
    else:
        hw_tile = max(_LANE, (hw_tile // _LANE) * _LANE)

    n_k = pl.cdiv(HW, hw_tile)
    tail_valid = HW - (n_k - 1) * hw_tile       # valid lanes in the last spatial tile
    return b_tile, n_b, hw_tile, n_k, tail_valid, need_bytes(b_tile, hw_tile)


def _make_kernel(C, b_tile, hw_tile, n_k, tail_valid):
    n_chunks = hw_tile // _LANE
    partial_tail = (tail_valid != hw_tile)      # static: last spatial tile is partial

    def kernel(x_ref, w_ref, b_ref, o_ref, lane_acc):
        # x_ref:    (b_tile, C, hw_tile) native dtype VMEM tile (pipelined)
        # w_ref:    (1, C) f32 VMEM, already scaled by 1/(H*W) (resident)
        # b_ref:    (1, 1) f32 SMEM scalar
        # o_ref:    (b_tile, 1) f32 output tile (resident across the reduction axis)
        # lane_acc: (b_tile, C, 128) f32 per-lane accumulator scratch
        k = pl.program_id(1)

        @pl.when(k == 0)
        def _():
            lane_acc[...] = jnp.zeros_like(lane_acc)

        def accumulate(tail):
            # VPU-only steady state: fold each 128-lane chunk into the per-lane
            # accumulator (upcast to f32 in-register).  The cross-lane reduce is
            # deferred to the finalize block below.
            for j in range(n_chunks):
                lo = j * _LANE
                if tail and lo >= tail_valid:
                    break                                   # chunk fully past HW: skip
                v = x_ref[:, :, lo:lo + _LANE].astype(jnp.float32)
                if tail and lo + _LANE > tail_valid:
                    # Mask garbage lanes of the partial boundary chunk.
                    idx = lax.broadcasted_iota(jnp.int32, v.shape, 2)
                    v = jnp.where(idx < (tail_valid - lo), v, 0.0)
                lane_acc[...] += v

        if partial_tail:
            @pl.when(k == n_k - 1)
            def _():
                accumulate(True)
            if n_k > 1:
                @pl.when(k < n_k - 1)
                def _():
                    accumulate(False)
        else:
            accumulate(False)

        @pl.when(k == n_k - 1)
        def _():
            # One cross-lane reduce (XLU) + channel weighting + bias + threshold,
            # executed once per batch tile.
            s = jnp.sum(lane_acc[...], axis=-1)                               # (b_tile, C)
            sigma = jnp.sum(s * w_ref[...], axis=-1, keepdims=True) + b_ref[0, 0]
            o_ref[...] = (sigma > 0.0).astype(jnp.float32)                    # eval binarization

    return kernel


def binary_selection_forward(x_nchw, weight, bias, *, b_tile=None, hw_tile=None,
                             vmem_budget_bytes=None, vmem_limit_bytes=None):
    """Eval-mode BinarySelectionLayer (do_batchnorm=False).

    x_nchw: (B, C, H, W) f32/bf16; weight: (1, C); bias: (1,).
    Returns (B, 1) float32 of {0., 1.}.
    """
    B, C, H, W = x_nchw.shape
    HW = H * W
    x = x_nchw.reshape(B, C, HW)                # native dtype; no pad, no f32 copy in HBM
    dtype_bytes = x.dtype.itemsize

    vmem_cap, budget = _vmem_config()
    if vmem_budget_bytes is not None:
        budget = int(vmem_budget_bytes)

    b_tile, n_b, hw_tile, n_k, tail_valid, need = _select_tiles(
        B, C, HW, dtype_bytes, budget, b_tile, hw_tile)

    if vmem_limit_bytes is None:
        vmem_limit_bytes = int(min(vmem_cap, max(need, budget) + (8 << 20)))

    # Fold the global-average-pool 1/(H*W) into the weight; params are tiny -> f32.
    w_scaled = (weight.astype(jnp.float32) / float(HW)).reshape(1, C)
    b_smem = bias.astype(jnp.float32).reshape(1, 1)

    kernel = _make_kernel(C, b_tile, hw_tile, n_k, tail_valid)

    cost = pl.CostEstimate(
        flops=2 * B * C * HW,
        transcendentals=0,
        bytes_accessed=int(B * C * HW * dtype_bytes + C * 4 + B * 4 + 4),
    )

    return pl.pallas_call(
        kernel,
        out_shape=jax.ShapeDtypeStruct((B, 1), jnp.float32),
        grid=(n_b, n_k),
        in_specs=[
            pl.BlockSpec((b_tile, C, hw_tile), lambda i, k: (i, 0, k)),   # x tile (pipelined)
            pl.BlockSpec((1, C), lambda i, k: (0, 0)),                    # scaled weight (resident)
            pl.BlockSpec(memory_space=pltpu.MemorySpace.SMEM),            # bias scalar
        ],
        out_specs=pl.BlockSpec((b_tile, 1), lambda i, k: (i, 0)),         # accumulator-style output
        scratch_shapes=[pltpu.VMEM((b_tile, C, _LANE), jnp.float32)],     # per-lane f32 accumulator
        compiler_params=pltpu.CompilerParams(
            dimension_semantics=("parallel", "arbitrary"),
            vmem_limit_bytes=int(vmem_limit_bytes),
        ),
        cost_estimate=cost,
    )(x, w_scaled, b_smem)


if __name__ == "__main__":
    root = jax.random.PRNGKey(0)

    def run_case(B, C, H, W, **kw):
        key = jax.random.fold_in(root, B * 100000 + C * 1000 + H * 10 + W)
        kx, kw_, kb = jax.random.split(key, 3)
        x = jax.random.normal(kx, (B, C, H, W), dtype=jnp.float32)
        bound = 1.0 / (C ** 0.5)                # nn.Linear(C, 1)-style init
        weight = jax.random.uniform(kw_, (1, C), jnp.float32, -bound, bound)
        bias = jax.random.uniform(kb, (1,), jnp.float32, -bound, bound)

        out = jax.block_until_ready(binary_selection_forward(x, weight, bias, **kw))

        gap = jnp.mean(x, axis=(2, 3))                       # (B, C)
        ref = ((gap @ weight.T + bias) > 0.0).astype(jnp.float32)
        assert out.shape == (B, 1) and out.dtype == jnp.float32
        assert bool(jnp.array_equal(out, ref)), (out, ref)

    # (1) required small shape: two reduction steps (init / accumulate / finalize path)
    run_case(2, 4, 16, 16, hw_tile=128)
    # (2) HW=225 not lane-aligned -> exercises the in-kernel tail mask (no wrapper pad)
    run_case(2, 4, 15, 15)
    # (3) two parallel batch tiles + HW=49 < 128 tail mask
    run_case(16, 8, 7, 7)

    print("KERNEL_OK")
</pallas_src>

<mosaic_0001>
module attributes {stable_mosaic.version = 11 : i64} {
  func.func @kernel(%arg0: i32, %arg1: i32, %arg2: memref<2x4x128xf32, #tpu.memory_space<vmem>>, %arg3: memref<1x4xf32, #tpu.memory_space<vmem>>, %arg4: memref<1x1xf32, #tpu.memory_space<smem>>, %arg5: memref<2x1xf32, #tpu.memory_space<vmem>>, %arg6: memref<2x4x128xf32, #tpu.memory_space<vmem>>) attributes {dimension_semantics = [#tpu.dimension_semantics<parallel>, #tpu.dimension_semantics<arbitrary>], iteration_bounds = array<i64: 1, 2>, scalar_prefetch = 0 : i64, scratch_operands = 1 : i64, tpu.core_type = #tpu.core_type<tc>, window_params = [{transform_indices = @transform_0, window_bounds = array<i64: 2, 4, 128>}, {pipeline_mode = #tpu.pipeline_mode<synchronous>, transform_indices = @transform_1, window_bounds = array<i64: 1, 4>}, {transform_indices = @transform_2, window_bounds = array<i64: 1, 1>}, {transform_indices = @transform_3, window_bounds = array<i64: 2, 1>}]} {
    %c0_i32 = arith.constant 0 : i32
    %0 = arith.cmpi eq, %arg1, %c0_i32 : i32
    %1 = arith.extui %0 : i1 to i32
    %c0_i32_0 = arith.constant 0 : i32
    %2 = arith.cmpi ne, %1, %c0_i32_0 : i32
    scf.if %2 {
      %cst = arith.constant 0.000000e+00 : f32
      %10 = vector.broadcast %cst : f32 to vector<2x4x128xf32>
      %c0_10 = arith.constant 0 : index
      %c0_11 = arith.constant 0 : index
      %c0_12 = arith.constant 0 : index
      %11 = vector.load %arg6[%c0_10, %c0_11, %c0_12] : memref<2x4x128xf32, #tpu.memory_space<vmem>>, vector<2x4x128xf32>
      tpu.vector_store %arg6[%c0_10, %c0_11, %c0_12], %10 {strides = array<i32>} : memref<2x4x128xf32, #tpu.memory_space<vmem>>, vector<2x4x128xf32>,
    } else {
    }
    %c0 = arith.constant 0 : index
    %c0_1 = arith.constant 0 : index
    %c0_2 = arith.constant 0 : index
    %3 = vector.load %arg2[%c0, %c0_1, %c0_2] : memref<2x4x128xf32, #tpu.memory_space<vmem>>, vector<2x4x128xf32>
    %c0_3 = arith.constant 0 : index
    %c0_4 = arith.constant 0 : index
    %c0_5 = arith.constant 0 : index
    %4 = vector.load %arg6[%c0_3, %c0_4, %c0_5] : memref<2x4x128xf32, #tpu.memory_space<vmem>>, vector<2x4x128xf32>
    %5 = arith.addf %4, %3 : vector<2x4x128xf32>
    %c0_6 = arith.constant 0 : index
    %c0_7 = arith.constant 0 : index
    %c0_8 = arith.constant 0 : index
    %6 = vector.load %arg6[%c0_6, %c0_7, %c0_8] : memref<2x4x128xf32, #tpu.memory_space<vmem>>, vector<2x4x128xf32>
    tpu.vector_store %arg6[%c0_6, %c0_7, %c0_8], %5 {strides = array<i32>} : memref<2x4x128xf32, #tpu.memory_space<vmem>>, vector<2x4x128xf32>,
    %c1_i32 = arith.constant 1 : i32
    %7 = arith.cmpi eq, %arg1, %c1_i32 : i32
    %8 = arith.extui %7 : i1 to i32
    %c0_i32_9 = arith.constant 0 : i32
    %9 = arith.cmpi ne, %8, %c0_i32_9 : i32
    scf.if %9 {
      %c0_10 = arith.constant 0 : index
      %c0_11 = arith.constant 0 : index
      %c0_12 = arith.constant 0 : index
      %10 = vector.load %arg6[%c0_10, %c0_11, %c0_12] : memref<2x4x128xf32, #tpu.memory_space<vmem>>, vector<2x4x128xf32>
      %cst = arith.constant dense<0.000000e+00> : vector<2x4xf32>
      %11 = vector.multi_reduction <add>, %10, %cst [2] : vector<2x4x128xf32> to vector<2x4xf32>
      %c0_13 = arith.constant 0 : index
      %c0_14 = arith.constant 0 : index
      %12 = vector.load %arg3[%c0_13, %c0_14] : memref<1x4xf32, #tpu.memory_space<vmem>>, vector<1x4xf32>
      %13 = vector.broadcast %12 : vector<1x4xf32> to vector<2x4xf32>
      %14 = arith.mulf %11, %13 : vector<2x4xf32>
      %cst_15 = arith.constant dense<0.000000e+00> : vector<2xf32>
      %15 = vector.multi_reduction <add>, %14, %cst_15 [1] : vector<2x4xf32> to vector<2xf32>
      %16 = vector.shape_cast %15 : vector<2xf32> to vector<2x1xf32>
      %c0_16 = arith.constant 0 : index
      %c0_17 = arith.constant 0 : index
      %17 = memref.load %arg4[%c0_16, %c0_17] : memref<1x1xf32, #tpu.memory_space<smem>>
      %18 = vector.broadcast %17 : f32 to vector<2x1xf32>
      %19 = arith.addf %16, %18 : vector<2x1xf32>
      %cst_18 = arith.constant 0.000000e+00 : f32
      %20 = vector.broadcast %cst_18 : f32 to vector<2x1xf32>
      %21 = arith.cmpf ogt, %19, %20 : vector<2x1xf32>
      %22 = arith.extui %21 : vector<2x1xi1> to vector<2x1xi32>
      %23 = arith.sitofp %22 : vector<2x1xi32> to vector<2x1xf32>
      %c0_19 = arith.constant 0 : index
      %c0_20 = arith.constant 0 : index
      %24 = vector.load %arg5[%c0_19, %c0_20] : memref<2x1xf32, #tpu.memory_space<vmem>>, vector<2x1xf32>
      tpu.vector_store %arg5[%c0_19, %c0_20], %23 {strides = array<i32>} : memref<2x1xf32, #tpu.memory_space<vmem>>, vector<2x1xf32>,
    } else {
    }
    return
  }
  func.func @transform_0(%arg0: i32, %arg1: i32) -> (i32, i32, i32) {
    %c0_i32 = arith.constant 0 : i32
    %c0_i32_0 = arith.constant 0 : i32
    return %arg0, %c0_i32, %arg1 : i32, i32, i32
  }
  func.func @transform_1(%arg0: i32, %arg1: i32) -> (i32, i32) {
    %c0_i32 = arith.constant 0 : i32
    %c0_i32_0 = arith.constant 0 : i32
    %c0_i32_1 = arith.constant 0 : i32
    return %c0_i32, %c0_i32_0 : i32, i32
  }
  func.func @transform_2(%arg0: i32, %arg1: i32) -> (i32, i32) {
    %c0_i32 = arith.constant 0 : i32
    %c0_i32_0 = arith.constant 0 : i32
    %c0_i32_1 = arith.constant 0 : i32
    return %c0_i32, %c0_i32_0 : i32, i32
  }
  func.func @transform_3(%arg0: i32, %arg1: i32) -> (i32, i32) {
    %c0_i32 = arith.constant 0 : i32
    %c0_i32_0 = arith.constant 0 : i32
    return %arg0, %c0_i32 : i32, i32
  }
}

</mosaic_0001>

<bundles_post_ra>
// kernel: tpu_custom_call.1
= control target key start
LH: loop header
LB: loop body
LE: loop exit
PB: predicated region body
PF: predicated region fallthrough
CT: control target
= control target key end

     0   :  { %s628_s0 = inlined_call_operand.hbm [shape: f32[2,4,256], index: 0, kind: input, shape index: {}]   ;;  %s629_s1 = inlined_call_operand.vmem [shape: f32[1,4], index: 1, kind: input, shape index: {}]   ;;  %s630_s2 = inlined_call_operand.<no memory space> [shape: f32[1,1], index: 2, kind: input, shape index: {}]   ;;  %s631_s3 = inlined_call_operand.vmem [shape: f32[2,1], index: 3, kind: output, shape index: {}]  }
   0x1   :  { %8 = sst [smem:[#allocation3]] %s630_s2 }
   0x2   :  { %9 = vsyncpa [#allocation5], 0 }
   0x3   :  { %11 = vsyncpa [#allocation5 + $0x1], 0  ;;  %s537_s14 = smov 0   ;;  %s539_s15 = smov 0  }
   0x4   :  { %s541_s16 = smov 0   ;;  %s543_s17 = smov 0  }
   0x5   :  { %s545_s18 = smov 0   ;;  %s547_s19 = smov 0  }
   0x6 LB: > { %s347_s2 = sadd.s32 4294967295, %s506_s19   ;;  %s26_s20 = sadd.s32 1, %s502_s18  ;;  %s506_s19 = sphi %s547_s19, %s17_s19   ;;  %s502_s18 = sphi %s545_s18, %s638_s18   ;;  %s498_s17 = sphi %s543_s17, %s637_s17   ;;  %s494_s16 = sphi %s541_s16, %s636_s16   ;;  %s490_s15 = sphi %s539_s15, %s635_s15   ;;  %s486_s14 = sphi %s537_s14, %s634_s14  }
   0x7   : > { %p27_p0 = scmp.ge.s32.totalorder %s26_s20, 2  ;;  %s38_s21 = sadd.s32 1, %s494_s16 }
   0x8   : > { %p45_p1 = scmp.ne.s32.totalorder %s494_s16, %s490_s15  ;;  %p46_p2 = scmp.eq.s32.totalorder %s506_s19, 0 }
   0x9   : > { %s640_s20 = smov (%p27_p0, %s26_s20), 0  ;;  %p51_p4 = scmp.ne.s32.totalorder %s490_s15, %s486_s14 }
   0xa   : > { %p573_p3 = por %p46_p2, %p45_p1  ;;  %s34_s23 = ssub.s32 %s502_s18, %s640_s20 }
   0xb   : > { %p52_p5 = scmp.eq.s32.totalorder %s347_s2, 0  ;;  %p36_p6 = scmp.eq.s32.totalorder %s34_s23, 0 }
   0xc   : > { %p366_p8 = scmp.lt.s32.totalorder %s506_s19, 2  ;;  %s149_s26 = sand.u32 1, %s494_s16  }
   0xd   : > { %p580_p7 = por %p52_p5, %p51_p4  ;;  %s351_s27 = sshll.u32 %s502_s18, 2 }
   0xe   : > { %s586_s25 = scalar_select %p36_p6, %s494_s16, %s38_s21  }
   0xf   : > { %s350_s28 = sshll.u32 %s149_s26, 3  ;;  %s160_s4 = scalar_lea.hbm %s628_s0, %s351_s27 }
  0x10   : > { %s161_s5 = sshll.u32 %s160_s4, 4  ;;  %s153_s6 = scalar_lea.vmem [#allocation4], %s350_s28  ;;  %s162_s5 = int_to_ptr.hbm [resolvable:$true] %s161_s5 }
  0x11   : > { %s163_s7 = sshll.u32 %s153_s6, 4  ;;  %p363_p9 = pnand %p366_p8, %p573_p3  ;;  %s164_s7 = int_to_ptr.vmem [resolvable:$true] %s163_s7 }
  0x12   : > { %p352_p10 = scmp.ge.s32.totalorder %s506_s19, 1  ;;  %s150_s8 = scalar_lea.sflag [#allocation5], %s149_s26 }
  0x13   : > { %s508_s9 = smov 128   ;;  %s509_s10 = smov 64  }
  0x14   : > { %s510_s11 = smov 4   ;;  %p171_p11 = scmp.lt.s32.totalorder %s506_s19, 3 }
  0x15   : > { %365 = dma.hbm_to_vmem [thread:$0]  (!%p363_p9), %s162_s5, 128, %s164_s7, %s150_s8, %s508_s9, %s509_s10, %s510_s11  }
  0x16   : > { %p172_p12 = pnand %p352_p10, %p171_p11 }
  0x17   : > { %s177_s12 = sand.u32 (!%p172_p12), 1, %s490_s15  }
  0x18   : > { %175 = sbr.rel (%p172_p12) target bundleno = 419 (0x1a3), region = 32  ;;  %s353_s13 = sshll.u32 (!%p172_p12), %s177_s12, 3 }
  0x19   : > { %s178_s14 = scalar_lea.sflag (!%p172_p12), [#allocation5], %s177_s12  ;;  %s181_s2 = scalar_lea.vmem (!%p172_p12), [#allocation4], %s353_s13 }
  0x1d   : > { %481 = dma.done.wait (%p580_p7), %s178_s14, 128  }
  0x1e   : > { %483 = vsyncadd (%p580_p7), %s178_s14, 4294967168  ;;  %p354_p13 = scmp.ne.s32.totalorder %s498_s17, 0 }
  0x20   : > { %212 = sbr.rel (%p354_p13) target bundleno = 40 (0x28), region = 40 }
  0x25   : > { %v511_v0 = vmov 0.0  }
  0x26   : > { %213 = vst [vmem:[#allocation2] sm:$0xf] %v511_v0 }
  0x27   : > { %214 = vst [vmem:[#allocation2 + $0x4] sm:$0xf] %v511_v0 }
  0x28 PF: > { %v215_v1 = vld [vmem:[%s181_s2] sm:$0xf]  ;;  %v216_v3 = vld [vmem:[%s181_s2 + $0x4] sm:$0xf]  ;;  %p355_p0 = scmp.ne.s32.totalorder %s498_s17, 1 }
  0x29   : > { %s267_s17 = sld [smem:[#allocation3]] (!%p355_p0) }
  0x2d   : > { %v217_v2 = vld [vmem:[#allocation2] sm:$0xf]  ;;  %226 = sbr.rel (%p355_p0) target bundleno = 419 (0x1a3), region = 44 }
  0x2e   : > { %v219_v4 = vadd.f32 %v217_v2, %v215_v1  ;;  %v218_v5 = vld [vmem:[#allocation2 + $0x4] sm:$0xf] }
  0x2f   : > { %v220_v6 = vadd.f32 %v218_v5, %v216_v3 }
  0x30   : > { %221 = vst [vmem:[#allocation2] sm:$0xf] %v219_v4 }
  0x31   : > { %222 = vst [vmem:[#allocation2 + $0x4] sm:$0xf] %v220_v6 }
  0x32   : > { %vm229_vm0 = vcmask 1043456   ;;  %v239_v8 = vlaneseq  ;;  %v425_v13 = vld [vmem:[%s629_s1] ss:$0 sm:$0xff]  ;;  %v512_v14 = vmov 0   ;;  %vm260_vm1 = vcmask 1041409  }
  0x33   : > { %423 = vset.pattern.permute.xlu2 %v512_v14  ;;  %424 = vset.pattern.permute.xlu0 %v512_v14  ;;  %vm263_vm2 = vcmask 25600   ;;  %v268_v27 = vstv %s267_s17  ;;  %vm273_vm3 = vcmask 1024   ;;  %v513_v30 = vmov 0.0  }
  0x34   : > { %v240_v10 = vshrl.u32 %v239_v8, 7  ;;  %v257_v20 = vand.u32 127, %v239_v8 }
  0x36   : > { %421 = vset.pattern.permute.xlu1 %v240_v10 }
  0x37   : > { %v227_v7 = vld [vmem:[#allocation2] sm:$0xf] }
  0x38   : > { %v230_v9 = vsel %vm229_vm0, %v227_v7, 0.0  ;;  %v228_v11 = vld [vmem:[#allocation2 + $0x4] sm:$0xf] }
  0x39   : > { %231 = vadd.xlane.f32.xlu0 %v230_v9  ;;  %v233_v12 = vsel %vm229_vm0, %v228_v11, 0.0 }
  0x3e   : > { %243 = vperm.xlu1 %421, %v425_v13  }
  0x41   : > { %234 = vadd.xlane.f32.xlu0 %v233_v12 }
  0x46   : > { %422 = vset.pattern.permute.xlu1 %v512_v14 }
  0xac   : > { %v232_v15 = vpop.xlane.xlu0 %231 }
  0xb0   : > { %v244_v17 = vpop.permute.xlu1 %243 }
  0xb1   : > { %v246_v18 = vmul.f32 %v244_v17, %v232_v15 }
  0xb3   : > { %251 = vperm.xlu1 %422, %v246_v18  }
  0xb4   : > { %v235_v16 = vpop.xlane.xlu0 %234 }
  0xb5   : > { %v247_v19 = vmul.f32 %v244_v17, %v235_v16 }
  0xb7   : > { %254 = vperm.xlu2 %423, %v247_v19  }
 0x111   : > { %v255_v21 = vpop.permute.xlu2 %254 }
 0x112   : > { %v259_v23 = vperm.slane %v255_v21, %v257_v20 }
 0x125   : > { %v252_v22 = vpop.permute.xlu1 %251 }
 0x126   : > { %v258_v24 = vperm.slane %v252_v22, %v257_v20 }
 0x128   : > { %v261_v25 = vsel %vm260_vm1, %v259_v23, %v258_v24 }
 0x129   : > { %v264_v26 = vsel %vm263_vm2, %v261_v25, 0.0 }
 0x12a   : > { %265 = vadd.xlane.f32.xlu2 %v264_v26 }
 0x19d   : > { %v266_v28 = vpop.xlane.xlu2 %265 }
 0x19e   : > { %v269_v29 = vadd.f32 %v268_v27, %v266_v28 }
 0x1a0   : > { %vm270_vm4 = vcmp.gt.f32.partialorder %v269_v29, 0.0 }
 0x1a1   : > { %v356_v31 = vsel %vm270_vm4, 1.0, %v513_v30 }
 0x1a2   : > { %274 = vst.msk [vmem:[%s631_s3] sm:$0x3] %vm273_vm3, %v356_v31 }
 0x1a3 PF: > { %s17_s19 = sadd.s32 1, %s506_s19   ;;  %s634_s14 = smov %s490_s15 }
 0x1a4   : > { %p14_p1 = scmp.ge.s32.totalorder %s17_s19, 4   ;;  %s635_s15 = smov %s494_s16 }
 0x1a5   : > { %s636_s16 = smov %s586_s25  ;;  %s637_s17 = smov %s502_s18 }
 0x1a6   : > { %s638_s18 = smov %s640_s20  ;;  %16 = sbr.rel (!%p14_p1) target bundleno = 6 (0x6), region = 80 }
 0x1ab   :  { %294 = vsyncpa [#allocation5], 1 }
 0x1ac   :  { %296 = vsyncpa [#allocation5 + $0x1], 1 }

</bundles_post_ra>
